<compile_context>
chip_gen: v7x
topology: tpu7x:2x2x1
jax: 0.10.0
libtpu: 0.0.40
codegen_flags: <defaults>
</compile_context>

<pallas_src>
import functools

import numpy as np
import jax
import jax.numpy as jnp
from jax.experimental import pallas as pl
from jax.experimental.pallas import tpu as pltpu


def make_sinusoid_table(n_position: int, d_hid: int) -> jnp.ndarray:
    """Deterministic sinusoid position encoding table, shape (1, n_position, d_hid)."""
    pos = np.arange(n_position, dtype=np.float64)[:, None]          # (P, 1)
    hid = np.arange(d_hid, dtype=np.float64)[None, :]                # (1, D)
    angle = pos / np.power(10000.0, 2.0 * (hid // 2) / d_hid)        # (P, D)
    table = np.empty_like(angle)
    table[:, 0::2] = np.sin(angle[:, 0::2])
    table[:, 1::2] = np.cos(angle[:, 1::2])
    return jnp.asarray(table[None, :, :], dtype=jnp.float32)         # (1, P, D)


# ----------------------------------------------------------------------------
# VMEM budget (generation aware)
# ----------------------------------------------------------------------------
@functools.lru_cache(maxsize=1)
def _vmem_budget_bytes() -> int:
    """Usable VMEM budget for this kernel's live buffers (and vmem_limit_bytes).

    Uses ~3/4 of physical VMEM (v5e/v6e: 128 MiB, v7x: 64 MiB), capped at
    96 MiB.  Falls back to a v7x-safe 48 MiB if the query is unavailable.
    """
    cap = 64 * 1024 * 1024
    try:
        info = pltpu.get_tpu_info()
        cap = int(getattr(info, "vmem_capacity_bytes", cap))
    except Exception:
        pass
    return min(cap * 3 // 4, 96 * 1024 * 1024)


# ----------------------------------------------------------------------------
# Kernels
# ----------------------------------------------------------------------------
def _pos_add_seq_kernel(x_ref, pos_ref, o_ref):
    # Layout A: x_ref (bt, st, D), pos_ref (st, D) -> broadcast add on the VPU.
    o_ref[...] = x_ref[...] + pos_ref[...]


def _pos_add_flat_kernel(x_ref, pos_ref, o_ref, *, resident):
    # Layout B: x_ref (rb, cb).
    if resident:
        # pos_ref holds the whole table reshaped to (n_cb, cb); row j is the
        # pos slice for column-block j (dynamic sublane index, well supported).
        j = pl.program_id(0)
        o_ref[...] = x_ref[...] + pos_ref[pl.ds(j, 1), :]
    else:
        # pos_ref is the (1, cb) tile selected by the BlockSpec index_map.
        o_ref[...] = x_ref[...] + pos_ref[...]


# ----------------------------------------------------------------------------
# Layout A: D % 128 == 0, blocks are (groups of) whole / partial sequences.
# ----------------------------------------------------------------------------
def _forward_seq(x, pos, budget, in_place):
    B, S, D = x.shape
    itemsize = x.dtype.itemsize
    row_mult = max(1, 32 // itemsize)          # 8 f32 / 16 bf16 / 32 int8
    seq_bytes = S * D * itemsize

    # Live footprint ~= 4 * x_tile (double-buffered in + out) + 2 * pos block.
    tile_budget = min(8 * 1024 * 1024, budget // 6)

    if seq_bytes <= tile_budget:
        # Whole sequences per block: fully contiguous HBM segments.
        st = S
        bt_cap = min(B, max(1, tile_budget // seq_bytes))
        bt = 1
        for cand in range(1, bt_cap + 1):
            if B % cand == 0:
                bt = cand
        if bt == B and B >= 2:                 # keep >= 2 blocks for megacore
            bt = 1
            for cand in range(1, B // 2 + 1):
                if B % cand == 0:
                    bt = cand
    else:
        # One sequence doesn't fit: tile the sequence axis instead.
        bt = 1
        if S % row_mult != 0:
            return None                        # can't tile legally -> caller falls back
        max_st = tile_budget // (D * itemsize)
        if max_st < row_mult:
            return None                        # even a minimal tile blows the budget
        st = row_mult
        cand = row_mult
        while cand <= min(S, max_st):
            if S % cand == 0:
                st = cand
            cand += row_mult

    # If the grid collapsed to a single block, split the sequence window once.
    if (S // st) * (B // bt) < 2:
        half = st // 2
        if half >= row_mult and half % row_mult == 0 and S % half == 0:
            st = half

    grid = (S // st, B // bt)                  # batch innermost -> pos block held per seq-block
    cost = pl.CostEstimate(
        flops=B * S * D,
        transcendentals=0,
        bytes_accessed=(2 * B * S * D + S * D) * itemsize,
    )

    return pl.pallas_call(
        _pos_add_seq_kernel,
        out_shape=jax.ShapeDtypeStruct((B, S, D), x.dtype),
        grid_spec=pltpu.PrefetchScalarGridSpec(
            num_scalar_prefetch=0,
            grid=grid,
            in_specs=[
                pl.BlockSpec((bt, st, D), lambda j, i: (i, j, 0)),   # x tile
                pl.BlockSpec((st, D), lambda j, i: (j, 0)),          # pos slice
            ],
            out_specs=pl.BlockSpec((bt, st, D), lambda j, i: (i, j, 0)),
        ),
        compiler_params=pltpu.CompilerParams(
            dimension_semantics=("parallel", "parallel"),
            vmem_limit_bytes=budget,
        ),
        cost_estimate=cost,
        input_output_aliases={0: 0} if in_place else {},
    )(x, pos)


# ----------------------------------------------------------------------------
# Layout B: flatten to (B, S*D) (lane-dense even when D % 128 != 0).
# ----------------------------------------------------------------------------
def _forward_flat(x, pos, budget, in_place):
    B, S, D = x.shape
    cols = S * D
    itemsize = x.dtype.itemsize
    row_mult = max(1, 32 // itemsize)

    rb_full = (B % row_mult != 0)              # row tile must be the full dim B
    rb_base = B if rb_full else row_mult

    # Keep the whole pos row resident in VMEM when it fits comfortably.
    pos_resident_bytes = 2 * cols * itemsize
    resident = pos_resident_bytes <= budget // 3

    tile_budget = min(8 * 1024 * 1024,
                      (budget - (pos_resident_bytes if resident else 0)) // 5)
    if tile_budget < 128 * itemsize:
        return None

    # Column tile: largest multiple of 128 dividing cols that fits the budget.
    max_cb = (tile_budget // (rb_base * itemsize)) // 128 * 128
    if max_cb < 128:
        return None                            # VMEM guard for the rb == B fallback
    cb = 0
    for k in range(min(cols, max_cb) // 128, 0, -1):
        cand = 128 * k
        if cols % cand == 0:
            cb = cand
            break
    if cb == 0:
        return None

    if rb_full:
        rb = B
    else:
        rb = row_mult
        while B % (rb * 2) == 0 and (rb * 2) * cb * itemsize <= tile_budget:
            rb *= 2

    # Keep >= 2 blocks along a parallel axis (megacore) when divisibility allows.
    if (cols // cb) * (B // rb) < 2:
        if cb % 256 == 0:
            cb //= 2
        elif (not rb_full) and rb >= 2 * row_mult:
            rb //= 2

    n_cb = cols // cb
    x2d = x.reshape(B, cols)
    if resident:
        pos_in = pos.reshape(n_cb, cb)
        pos_spec = pl.BlockSpec((n_cb, cb), lambda j, i: (0, 0))     # resident, no re-fetch
    else:
        pos_in = pos.reshape(1, cols)
        pos_spec = pl.BlockSpec((1, cb), lambda j, i: (0, j))        # fetched once per col-block

    grid = (n_cb, B // rb)                     # rows innermost
    cost = pl.CostEstimate(
        flops=B * cols,
        transcendentals=0,
        bytes_accessed=(2 * B * cols + cols) * itemsize,
    )

    out2d = pl.pallas_call(
        functools.partial(_pos_add_flat_kernel, resident=resident),
        out_shape=jax.ShapeDtypeStruct((B, cols), x.dtype),
        grid_spec=pltpu.PrefetchScalarGridSpec(
            num_scalar_prefetch=0,
            grid=grid,
            in_specs=[
                pl.BlockSpec((rb, cb), lambda j, i: (i, j)),         # x tile
                pos_spec,
            ],
            out_specs=pl.BlockSpec((rb, cb), lambda j, i: (i, j)),
        ),
        compiler_params=pltpu.CompilerParams(
            dimension_semantics=("parallel", "parallel"),
            vmem_limit_bytes=budget,
        ),
        cost_estimate=cost,
        input_output_aliases={0: 0} if in_place else {},
    )(x2d, pos_in)
    return out2d.reshape(B, S, D)


# ----------------------------------------------------------------------------
# Public wrapper
# ----------------------------------------------------------------------------
@functools.partial(jax.jit, static_argnames=("force_pallas", "in_place"))
def positional_encoding_forward(x, pos_table, force_pallas=False, in_place=False):
    """x: (B, S, D); pos_table: (1, n_position, D). Returns x + pos_table[:, :S]."""
    B, S, D = x.shape
    n_position = pos_table.shape[1]
    if S > n_position:
        raise ValueError(f"sequence length {S} exceeds table size {n_position}")

    pos = pos_table[0, :S, :].astype(x.dtype)                        # (S, D), cast once
    itemsize = jnp.dtype(x.dtype).itemsize
    total = B * S * D
    budget = _vmem_budget_bytes()

    # Tiny tensors: the fused XLA add is cheaper than kernel launch/step cost.
    if total * itemsize < (1 << 16) and not force_pallas:
        return x + pos[None, :, :]

    # Layout A: contiguous whole-sequence blocks (preferred when D is lane-dense).
    if D % 128 == 0:
        out = _forward_seq(x, pos, budget, in_place)
        if out is not None:
            return out

    # Layout B: flatten to (B, S*D) so the last dim is a multiple of 128.
    if (S * D) % 128 == 0:
        out = _forward_flat(x, pos, budget, in_place)
        if out is not None:
            return out

    # TODO(synk): shapes whose flattened row is not a multiple of 128 lanes (or
    # that cannot be tiled inside the VMEM budget) fall back to plain XLA.
    return x + pos[None, :, :]


if __name__ == "__main__":
    # Small shapes consistent with the module: batch=2, seq=8, hidden=32.
    N_POSITION = 200
    B, S, D = 2, 8, 32

    key0, key1, key2 = jax.random.split(jax.random.PRNGKey(0), 3)
    x = jax.random.normal(key0, (B, S, D), dtype=jnp.float32)
    pos_table = make_sinusoid_table(N_POSITION, D)

    # Layout B (D % 128 != 0), resident pos table, aliased output path.
    out = positional_encoding_forward(x, pos_table, force_pallas=True, in_place=True)
    out = jax.block_until_ready(out)
    ref = x + pos_table[:, :S, :]
    assert out.shape == (B, S, D)
    assert jnp.allclose(out, ref, atol=1e-6, rtol=0), "mismatch vs reference (small)"

    # Larger shape: layout A (D % 128 == 0), 2 x 4 MiB contiguous blocks.
    B2, S2, D2 = 16, 1024, 128
    pos_table2 = make_sinusoid_table(2048, D2)
    x2 = jax.random.normal(key1, (B2, S2, D2), dtype=jnp.float32)
    out2 = jax.block_until_ready(positional_encoding_forward(x2, pos_table2))
    ref2 = x2 + pos_table2[:, :S2, :]
    assert jnp.allclose(out2, ref2, atol=1e-6, rtol=0), "mismatch vs reference (large)"

    # Awkward batch (B=3, D=96): exercises the guarded rb == B flattened path.
    B3, S3, D3 = 3, 64, 96
    pos_table3 = make_sinusoid_table(256, D3)
    x3 = jax.random.normal(key2, (B3, S3, D3), dtype=jnp.float32)
    out3 = jax.block_until_ready(
        positional_encoding_forward(x3, pos_table3, force_pallas=True))
    ref3 = x3 + pos_table3[:, :S3, :]
    assert jnp.allclose(out3, ref3, atol=1e-6, rtol=0), "mismatch vs reference (awkward)"

    print("KERNEL_OK")
</pallas_src>

<mosaic_0001>
module attributes {stable_mosaic.version = 11 : i64} {
  func.func @_pos_add_flat_kernel(%arg0: i32, %arg1: i32, %arg2: memref<2x128xf32, #tpu.memory_space<vmem>>, %arg3: memref<2x128xf32, #tpu.memory_space<vmem>>, %arg4: memref<2x128xf32, #tpu.memory_space<vmem>>) attributes {dimension_semantics = [#tpu.dimension_semantics<parallel>, #tpu.dimension_semantics<parallel>], iteration_bounds = array<i64: 2, 1>, scalar_prefetch = 0 : i64, scratch_operands = 0 : i64, tpu.core_type = #tpu.core_type<tc>, window_params = [{transform_indices = @transform_0, window_bounds = array<i64: 2, 128>}, {pipeline_mode = #tpu.pipeline_mode<synchronous>, transform_indices = @transform_1, window_bounds = array<i64: 2, 128>}, {transform_indices = @transform_2, window_bounds = array<i64: 2, 128>}]} {
    %c0 = arith.constant 0 : index
    %c0_0 = arith.constant 0 : index
    %0 = vector.load %arg2[%c0, %c0_0] : memref<2x128xf32, #tpu.memory_space<vmem>>, vector<2x128xf32>
    %1 = arith.index_cast %arg0 : i32 to index
    %c0_1 = arith.constant 0 : index
    %2 = vector.load %arg3[%1, %c0_1] : memref<2x128xf32, #tpu.memory_space<vmem>>, vector<1x128xf32>
    %3 = vector.broadcast %2 : vector<1x128xf32> to vector<2x128xf32>
    %4 = arith.addf %0, %3 : vector<2x128xf32>
    %c0_2 = arith.constant 0 : index
    %c0_3 = arith.constant 0 : index
    %5 = vector.load %arg4[%c0_2, %c0_3] : memref<2x128xf32, #tpu.memory_space<vmem>>, vector<2x128xf32>
    tpu.vector_store %arg4[%c0_2, %c0_3], %4 {strides = array<i32>} : memref<2x128xf32, #tpu.memory_space<vmem>>, vector<2x128xf32>,
    return
  }
  func.func @transform_0(%arg0: i32, %arg1: i32) -> (i32, i32) {
    %c0_i32 = arith.constant 0 : i32
    return %arg1, %arg0 : i32, i32
  }
  func.func @transform_1(%arg0: i32, %arg1: i32) -> (i32, i32) {
    %c0_i32 = arith.constant 0 : i32
    %c0_i32_0 = arith.constant 0 : i32
    %c0_i32_1 = arith.constant 0 : i32
    return %c0_i32, %c0_i32_0 : i32, i32
  }
  func.func @transform_2(%arg0: i32, %arg1: i32) -> (i32, i32) {
    %c0_i32 = arith.constant 0 : i32
    return %arg1, %arg0 : i32, i32
  }
}

</mosaic_0001>

<bundles_post_ra>
// kernel: squeeze.1
= control target key start
LH: loop header
LB: loop body
LE: loop exit
PB: predicated region body
PF: predicated region fallthrough
CT: control target
= control target key end

     0   :  { %s7_s6 = smov 3  ;;  %s14_s9 = smov 3  ;;  %vm4_vm0 = vcmask 261120   ;;  %vm11_vm1 = vcmask 1048320   ;;  %vm18_vm2 = vcmask 785920   ;;  %vm25_vm3 = vcmask 523520   ;;  %s67_s0 = inlined_call_operand.vmem [shape: f32[1,8,32], index: 0, kind: input, shape index: {}]   ;;  %s68_s1 = inlined_call_operand.vmem [shape: f32[2,128], index: 1, kind: output, shape index: {}]  }
   0x1   :  { %v33_v0 = vld [vmem:[%s67_s0 + $0x3] ss:$4 sm:%s7_s6]   ;;  %s39_s10 = smov 96   ;;  %s21_s11 = smov 3  ;;  %v34_v1 = vld [vmem:[%s67_s0 + $0x2] ss:$4 sm:%s14_s9]  }
   0x2   :  { %9 = vrot.lane.b32.xlu0 %v33_v0, %s39_s10  ;;  %v35_v2 = vld [vmem:[%s67_s0 + $0x1] ss:$4 sm:%s21_s11]   ;;  %s2_s16 = smov 3  ;;  %s40_s17 = smov 32  }
   0x3   :  { %23 = vrot.lane.b32.xlu1 %v35_v2, %s40_s17  ;;  %v3_v3 = vld [vmem:[%s67_s0] ss:$4 sm:%s2_s16]   ;;  %s41_s0 = smov 64  }
   0x4   :  { %5 = vst.msk [vmem:[#allocation0] sm:$0x3] %vm4_vm0, %v3_v3  }
   0x6   :  { %16 = vrot.lane.b32.xlu0 %v34_v1, %s41_s0 }
  0x74   :  { %v10_v4 = vpop.permute.xlu0 %9  }
  0x75   :  { %12 = vst.msk [vmem:[#allocation0] sm:$0x3] %vm11_vm1, %v10_v4   ;;  %v24_v5 = vpop.permute.xlu1 %23  }
  0x78   :  { %v17_v6 = vpop.permute.xlu0 %16  }
  0x79   :  { %19 = vst.msk [vmem:[#allocation0] sm:$0x3] %vm18_vm2, %v17_v6  }
  0x7a   :  { %26 = vst.msk [vmem:[#allocation0] sm:$0x3] %vm25_vm3, %v24_v5  }
  0x81   :  { %v30_v7 = vld [vmem:[#allocation0] sm:$0x3] }
  0x82   :  { %32 = vst [vmem:[%s68_s1] sm:$0x3] %v30_v7 }

// kernel: positional_encoding_forward.1
= control target key start
LH: loop header
LB: loop body
LE: loop exit
PB: predicated region body
PF: predicated region fallthrough
CT: control target
= control target key end

     0   :  { %s341_s9 = smov 0   ;;  %s343_s10 = smov 0   ;;  %s360_s0 = inlined_call_operand.vmem [shape: f32[2,256], index: 0, kind: input, shape index: {}, may-alias: {0,2}]   ;;  %s361_s1 = inlined_call_operand.vmem [shape: f32[2,128], index: 1, kind: input, shape index: {}]   ;;  %s362_s2 = inlined_call_operand.vmem [shape: f32[2,256], index: 2, kind: output, shape index: {}, may-alias: {0,2}]  }
   0x1   :  { %s322_s11 = smov 0  }
   0x2 LB: > { %s24_s12 = sadd.s32 1, %s320_s10  ;;  %p272_p0 = scmp.ge.s32.totalorder %s324_s11, 1  ;;  %s324_s11 = sphi %s322_s11, %s12_s11   ;;  %s320_s10 = sphi %s343_s10, %s364_s10   ;;  %s316_s9 = sphi %s341_s9, %s363_s9  }
   0x3   : > { %p26_p1 = scmp.ge.s32.totalorder %s24_s12, 2  ;;  %p131_p2 = scmp.lt.s32.totalorder %s324_s11, 3 }
   0x5   : > { %s366_s12 = smov (%p26_p1, %s24_s12), 0  ;;  %p132_p3 = pnand %p272_p0, %p131_p2 }
   0x6   : > { %p161_p4 = scmp.lt.s32.totalorder (!%p132_p3), %s316_s9, 1  ;;  %s176_s15 = scalar_lea.vmem (!%p132_p3), %s361_s1, %s316_s9 }
   0x7   : > { %135 = sbr.rel (%p132_p3) target bundleno = 21 (0x15), region = 28  ;;  %v275_v0 = vld [vmem:[%s176_s15] ss:$0 sm:$0xff] (!%p132_p3) }
   0xe   : > { %s368_s9 = smov (!%p161_p4, %s316_s9), 1 }
   0xf   : > { %s273_s16 = sshll.u32 %s368_s9, 1 }
  0x10   : > { %s166_s19 = scalar_lea.vmem %s360_s0, %s273_s16  ;;  %s174_s22 = scalar_lea.vmem %s362_s2, %s273_s16 }
  0x11   : > { %v175_v1 = vld [vmem:[%s166_s19] sm:$0x3] }
  0x12   : > { %v182_v2 = vadd.f32 %v275_v0, %v175_v1 }
  0x14   : > { %183 = vst [vmem:[%s174_s22] sm:$0x3] %v182_v2 }
  0x15 PF: > { %s12_s11 = sadd.s32 1, %s324_s11   ;;  %s363_s9 = smov %s320_s10 }
  0x16   : > { %p9_p5 = scmp.ge.s32.totalorder %s12_s11, 4   ;;  %s364_s10 = smov %s366_s12 }
  0x18   :  { %11 = sbr.rel (!%p9_p5) target bundleno = 2 (0x2), region = 59 }

</bundles_post_ra>
